<compile_context>
chip_gen: v7x
topology: tpu7x:2x2x1
jax: 0.10.0
libtpu: 0.0.40
codegen_flags: <defaults>
</compile_context>

<pallas_src>
import functools
import math

import jax
import jax.numpy as jnp
from jax.experimental import pallas as pl
from jax.experimental.pallas import tpu as pltpu


def _pe_add_kernel(scale_ref, x_ref, pe_ref, o_ref, *, batch, d_model):
    # scale_ref: SMEM (1,) f32 parameter
    # x_ref/o_ref: VMEM (seq_tile, batch*d_model) -- lane-dense flattened view
    # pe_ref:      VMEM (seq_tile, d_model)       -- broadcast over batch below
    scale = scale_ref[0]
    pe_scaled = scale * pe_ref[...].astype(jnp.float32)          # (T, D) f32
    if batch == 1:
        o_ref[...] = (x_ref[...].astype(jnp.float32) + pe_scaled).astype(o_ref.dtype)
    else:
        for b in range(batch):                                   # static unroll
            lo = b * d_model
            xv = x_ref[:, lo:lo + d_model].astype(jnp.float32)
            o_ref[:, lo:lo + d_model] = (xv + pe_scaled).astype(o_ref.dtype)


def make_pe(max_len, d_model, dtype=jnp.float32):
    """sin/cos table, shape [max_len, d_model] (same values as the PyTorch
    buffer, which just carries an extra singleton batch axis)."""
    position = jnp.arange(max_len, dtype=jnp.float32)[:, None]
    div_term = jnp.exp(
        jnp.arange(0, d_model, 2, dtype=jnp.float32) * (-math.log(10000.0) / d_model)
    )
    pe = jnp.zeros((max_len, d_model), jnp.float32)
    pe = pe.at[:, 0::2].set(jnp.sin(position * div_term))
    pe = pe.at[:, 1::2].set(jnp.cos(position * div_term))
    return pe.astype(dtype)


def _pick_seq_tile(seq_len, row_bytes, *, budget_bytes=2 << 20, min_steps=8):
    """Largest multiple-of-8 divisor of seq_len such that one x tile stays under
    ~budget_bytes and the grid gets >= ~min_steps steps when seq_len allows.
    Falls back to the full sequence (single grid step) if no divisor fits."""
    budget_rows = max(8, budget_bytes // max(1, row_bytes))
    step_rows = max(8, seq_len // min_steps)
    target = min(seq_len, budget_rows, step_rows)
    best = None
    for d in range(8, target + 1, 8):
        if seq_len % d == 0:
            best = d
    return best if best is not None else seq_len


def positional_encoding_fwd(x, pe_table, scale, *, seq_tile=None, donate_x=False):
    """Forward of PositionalEncoding (eval mode).

    x:        [S, B, D] activations (seq-major, like the PyTorch module)
    pe_table: [max_len, D] sin/cos table (see make_pe)
    scale:    [1] float32 learnable parameter
    """
    S, B, D = x.shape
    max_len, d_pe = pe_table.shape
    assert d_pe == D, f"pe d_model {d_pe} != x d_model {D}"
    assert S <= max_len, f"seq_len {S} exceeds pe max_len {max_len}"

    N = B * D
    x2 = x.reshape(S, N)                       # contiguous, free; lane-dense view
    pe = pe_table[:S].astype(x.dtype)          # keep pe in the activation dtype
    scale = scale.astype(jnp.float32).reshape((1,))

    itemsize = jnp.dtype(x.dtype).itemsize
    if seq_tile is None:
        seq_tile = _pick_seq_tile(S, N * itemsize)
    assert S % seq_tile == 0, "seq_tile must divide seq_len"
    assert seq_tile % 8 == 0 or seq_tile == S, "seq_tile must be a multiple of 8"

    kernel = functools.partial(_pe_add_kernel, batch=B, d_model=D)

    cost = pl.CostEstimate(
        flops=S * D * (B + 1),                               # scale*pe + x+pe
        transcendentals=0,
        bytes_accessed=(2 * S * N + S * D) * itemsize + 4,   # x in/out + pe + scale
    )

    out2 = pl.pallas_call(
        kernel,
        out_shape=jax.ShapeDtypeStruct((S, N), x.dtype),
        grid=(S // seq_tile,),
        in_specs=[
            pl.BlockSpec(memory_space=pltpu.MemorySpace.SMEM),   # scale (scalar)
            pl.BlockSpec((seq_tile, N), lambda i: (i, 0)),       # x (flattened)
            pl.BlockSpec((seq_tile, D), lambda i: (i, 0)),       # pe
        ],
        out_specs=pl.BlockSpec((seq_tile, N), lambda i: (i, 0)),
        compiler_params=pltpu.CompilerParams(
            dimension_semantics=("parallel",),
            vmem_limit_bytes=32 * 1024 * 1024,
        ),
        cost_estimate=cost,
        # Optionally reuse x's HBM buffer for the output (x2 is operand index 1).
        input_output_aliases={1: 0} if donate_x else {},
    )(scale, x2, pe)

    # TODO(synk): nn.Dropout(p=0.1) is identity in eval mode; training-mode
    # stochastic dropout is omitted (could be added with pltpu.prng_*).
    return out2.reshape(S, B, D)


if __name__ == "__main__":
    # Small shapes consistent with the module: seq=128, batch=2, d_model=32
    # (seq chosen so the grid actually has several pipelined steps).
    S, B, D = 128, 2, 32
    MAX_LEN = 1000

    key = jax.random.PRNGKey(0)
    x = jax.random.normal(key, (S, B, D), dtype=jnp.float32)

    # Deterministic parameter init, matching __init__: scale = ones(1).
    scale = jnp.ones((1,), dtype=jnp.float32)
    pe_table = make_pe(MAX_LEN, D)

    out = positional_encoding_fwd(x, pe_table, scale)
    out = jax.block_until_ready(out)

    # Pure-JAX reference check of the forward semantics (eval mode).
    ref = x + scale[0] * pe_table[:S][:, None, :]
    assert out.shape == (S, B, D)
    assert jnp.allclose(out, ref, atol=1e-6), "mismatch vs reference"

    print("KERNEL_OK")
</pallas_src>

<mosaic_0001>
module attributes {stable_mosaic.version = 11 : i64} {
  func.func @_pe_add_kernel(%arg0: i32, %arg1: memref<1xf32, #tpu.memory_space<smem>>, %arg2: memref<16x64xf32, #tpu.memory_space<vmem>>, %arg3: memref<16x32xf32, #tpu.memory_space<vmem>>, %arg4: memref<16x64xf32, #tpu.memory_space<vmem>>) attributes {dimension_semantics = [#tpu.dimension_semantics<parallel>], iteration_bounds = array<i64: 8>, scalar_prefetch = 0 : i64, scratch_operands = 0 : i64, tpu.core_type = #tpu.core_type<tc>, window_params = [{transform_indices = @transform_0, window_bounds = array<i64: 1>}, {transform_indices = @transform_1, window_bounds = array<i64: 16, 64>}, {transform_indices = @transform_2, window_bounds = array<i64: 16, 32>}, {transform_indices = @transform_3, window_bounds = array<i64: 16, 64>}]} {
    %c0 = arith.constant 0 : index
    %0 = memref.load %arg1[%c0] : memref<1xf32, #tpu.memory_space<smem>>
    %c0_0 = arith.constant 0 : index
    %c0_1 = arith.constant 0 : index
    %1 = vector.load %arg3[%c0_0, %c0_1] : memref<16x32xf32, #tpu.memory_space<vmem>>, vector<16x32xf32>
    %2 = vector.broadcast %0 : f32 to vector<16x32xf32>
    %3 = arith.mulf %2, %1 : vector<16x32xf32>
    %c0_2 = arith.constant 0 : index
    %c0_3 = arith.constant 0 : index
    %4 = vector.load %arg2[%c0_2, %c0_3] : memref<16x64xf32, #tpu.memory_space<vmem>>, vector<16x32xf32>
    %5 = arith.addf %4, %3 : vector<16x32xf32>
    %c0_4 = arith.constant 0 : index
    %c0_5 = arith.constant 0 : index
    %6 = vector.load %arg4[%c0_4, %c0_5] : memref<16x64xf32, #tpu.memory_space<vmem>>, vector<16x32xf32>
    tpu.vector_store %arg4[%c0_4, %c0_5], %5 {strides = array<i32>} : memref<16x64xf32, #tpu.memory_space<vmem>>, vector<16x32xf32>,
    %c0_6 = arith.constant 0 : index
    %c32 = arith.constant 32 : index
    %7 = vector.load %arg2[%c0_6, %c32] : memref<16x64xf32, #tpu.memory_space<vmem>>, vector<16x32xf32>
    %8 = arith.addf %7, %3 : vector<16x32xf32>
    %c0_7 = arith.constant 0 : index
    %c32_8 = arith.constant 32 : index
    %9 = vector.load %arg4[%c0_7, %c32_8] : memref<16x64xf32, #tpu.memory_space<vmem>>, vector<16x32xf32>
    tpu.vector_store %arg4[%c0_7, %c32_8], %8 {strides = array<i32>} : memref<16x64xf32, #tpu.memory_space<vmem>>, vector<16x32xf32>,
    return
  }
  func.func @transform_0(%arg0: i32) -> i32 {
    %c0_i32 = arith.constant 0 : i32
    %c0_i32_0 = arith.constant 0 : i32
    return %c0_i32 : i32
  }
  func.func @transform_1(%arg0: i32) -> (i32, i32) {
    %c0_i32 = arith.constant 0 : i32
    %c0_i32_0 = arith.constant 0 : i32
    return %arg0, %c0_i32 : i32, i32
  }
  func.func @transform_2(%arg0: i32) -> (i32, i32) {
    %c0_i32 = arith.constant 0 : i32
    %c0_i32_0 = arith.constant 0 : i32
    return %arg0, %c0_i32 : i32, i32
  }
  func.func @transform_3(%arg0: i32) -> (i32, i32) {
    %c0_i32 = arith.constant 0 : i32
    %c0_i32_0 = arith.constant 0 : i32
    return %arg0, %c0_i32 : i32, i32
  }
}

</mosaic_0001>

<bundles_post_ra>
// kernel: tpu_custom_call.1
= control target key start
LH: loop header
LB: loop body
LE: loop exit
PB: predicated region body
PF: predicated region fallthrough
CT: control target
= control target key end

     0   :  { %s347_s14 = smov 0   ;;  %s367_s0 = inlined_call_operand.<no memory space> [shape: f32[1], index: 0, kind: input, shape index: {}]   ;;  %s368_s1 = inlined_call_operand.vmem [shape: f32[128,64], index: 1, kind: input, shape index: {}]   ;;  %s369_s2 = inlined_call_operand.vmem [shape: f32[128,32], index: 2, kind: input, shape index: {}]   ;;  %s370_s3 = inlined_call_operand.vmem [shape: f32[128,64], index: 3, kind: output, shape index: {}]  }
   0x1   :  { %8 = sst [smem:[#allocation2]] %s367_s0 }
   0x2 LB: > { %s293_s15 = sadd.s32 4294967295, %s321_s14   ;;  %p297_p0 = scmp.ge.s32.totalorder %s321_s14, 1  ;;  %s321_s14 = sphi %s347_s14, %s14_s14  }
   0x3   : > { %p150_p1 = scmp.lt.s32.totalorder %s321_s14, 9 }
   0x5   : > { %p151_p2 = pnand %p297_p0, %p150_p1 }
   0x6   : > { %s298_s16 = sshll.u32 (!%p151_p2), %s293_s15, 1  ;;  %s197_s17 = sld [smem:[#allocation2]] (!%p151_p2)  ;;  %vm207_vm0 = vcmask (!%p151_p2), 261120   ;;  %vm222_vm1 = vcmask (!%p151_p2), 523520  }
   0x7   : > { %154 = sbr.rel (%p151_p2) target bundleno = 142 (0x8e), region = 32  ;;  %p180_p3 = scmp.lt.s32.totalorder (!%p151_p2), %s298_s16, 15 }
   0x8   : > { %s323_s27 = smov (!%p151_p2), 32  }
   0xc   : > { %v200_v0 = vstv (!%p151_p2), %s197_s17 }
   0xe   : > { %s372_s16 = smov (!%p180_p3, %s298_s16), 15 }
   0xf   : > { %s299_s0 = sshll.u32 %s372_s16, 3 }
  0x10   : > { %s189_s20 = scalar_lea.vmem %s369_s2, %s299_s0  ;;  %s183_s23 = scalar_lea.vmem %s368_s1, %s299_s0 }
  0x11   : > { %v198_v1 = vld [vmem:[%s189_s20] sm:$0xff]  ;;  %v199_v2 = vld [vmem:[%s189_s20 + $0x8] sm:$0xff]  ;;  %s195_s26 = scalar_lea.vmem %s370_s3, %s299_s0 }
  0x12   : > { %v201_v3 = vmul.f32 %v200_v0, %v198_v1  ;;  %v202_v4 = vmul.f32 %v200_v0, %v199_v2  ;;  %v203_v5 = vld [vmem:[%s183_s23] sm:$0xff]  ;;  %v204_v6 = vld [vmem:[%s183_s23 + $0x8] sm:$0xff] }
  0x14   : > { %214 = vrot.lane.b32.xlu0 %v201_v3, %s323_s27  ;;  %v205_v7 = vadd.f32 %v203_v5, %v201_v3  ;;  %v206_v8 = vadd.f32 %v204_v6, %v202_v4 }
  0x16   : > { %208 = vst.msk [vmem:[%s195_s26] sm:$0xff] %vm207_vm0, %v205_v7  ;;  %209 = vst.msk [vmem:[%s195_s26 + $0x8] sm:$0xff] %vm207_vm0, %v206_v8 }
  0x18   : > { %216 = vrot.lane.b32.xlu0 %v202_v4, %s323_s27 }
  0x86   : > { %v215_v9 = vpop.permute.xlu0 %214 }
  0x87   : > { %v220_v10 = vadd.f32 %v215_v9, %v203_v5 }
  0x89   : > { %223 = vst.msk [vmem:[%s195_s26] sm:$0xff] %vm222_vm1, %v220_v10 }
  0x8a   : > { %v217_v11 = vpop.permute.xlu0 %216 }
  0x8b   : > { %v221_v12 = vadd.f32 %v217_v11, %v204_v6 }
  0x8d   : > { %224 = vst.msk [vmem:[%s195_s26 + $0x8] sm:$0xff] %vm222_vm1, %v221_v12 }
  0x8e PF: > { %s14_s14 = sadd.s32 1, %s321_s14  }
  0x8f   : > { %p11_p4 = scmp.ge.s32.totalorder %s14_s14, 10  }
  0x91   :  { %13 = sbr.rel (!%p11_p4) target bundleno = 2 (0x2), region = 65 }

</bundles_post_ra>
